<compile_context>
chip_gen: v6e
topology: v6e:2x2x1
jax: 0.10.0
libtpu: 0.0.40
codegen_flags: <defaults>
</compile_context>

<pallas_src>
import functools

import jax
import jax.numpy as jnp
from jax.experimental import pallas as pl
from jax.experimental.pallas import tpu as pltpu


def _poly1_kernel(logits_ref, labels_ref, *rest, epsilon, has_weight):
    if has_weight:
        wrow_ref, out_ref = rest
    else:
        (out_ref,) = rest

    logits = logits_ref[...].astype(jnp.float32)                # (TN, C)
    labels = labels_ref[...]                                    # (TN, 1) int32
    tn, c = logits.shape

    # Mask selecting each row's true class (lane-axis iota vs. label column).
    class_ids = jax.lax.broadcasted_iota(jnp.int32, (tn, c), 1)
    is_label = class_ids == labels                              # (TN, C) bool

    # Numerically-stable log-sum-exp along the class (lane) axis.
    m = jnp.max(logits, axis=-1, keepdims=True)                 # (TN, 1)
    shifted = logits - m                                        # (TN, C)
    denom = jnp.sum(jnp.exp(shifted), axis=-1, keepdims=True)   # (TN, 1)
    log_denom = jnp.log(denom)                                  # (TN, 1)

    # Fused gather of the true-class (shifted) logit: exactly one lane matches.
    x_label = jnp.sum(jnp.where(is_label, shifted, 0.0),
                      axis=-1, keepdims=True)                   # (TN, 1)

    logp = x_label - log_denom        # log_softmax at the label   (TN, 1)
    pt = jnp.exp(logp)                # softmax at the label       (TN, 1)
    nll = -logp
    if has_weight:
        # Pre-gathered w[label] column streamed from the wrapper.
        nll = nll * wrow_ref[...].astype(jnp.float32)           # (TN, 1)

    out_ref[...] = (nll + epsilon * (1.0 - pt)).astype(out_ref.dtype)


def _tpu_vmem_capacity_bytes():
    try:
        return int(pltpu.get_tpu_info().vmem_capacity_bytes)
    except Exception:
        return 64 * 1024 * 1024  # conservative (v7x per-TC physical VMEM)


def _vmem_budget_and_limit():
    """(double-buffered working-set budget, vmem_limit_bytes) per generation."""
    cap = _tpu_vmem_capacity_bytes()
    if cap >= 96 * 1024 * 1024:
        # v5e / v6e: 128 MiB physical VMEM.  Use ~cap/3 for the working set
        # and raise the scoped limit well above the default.
        budget = cap // 3
        limit = min(cap - 32 * 1024 * 1024, 96 * 1024 * 1024)
    else:
        # v7x: 64 MiB per TensorCore.  Keep headroom under the smaller ceiling.
        budget = 22 * 1024 * 1024
        limit = min(48 * 1024 * 1024, (cap * 3) // 4)
    return budget, limit


def _row_align(itemsize):
    # Sublane alignment: 8 rows for f32, 16 for bf16, 32 for int8.
    return 8 * max(1, 4 // max(itemsize, 1))


def _pick_block_n(n, c, itemsize, has_weight):
    budget, _ = _vmem_budget_and_limit()
    row_align = _row_align(itemsize)
    # Double-buffered per-row bytes: logits row + labels + (gathered w) + f32 out.
    per_row = 2 * (c * itemsize + 4 + (4 if has_weight else 0) + 4)
    rows = budget // max(per_row, 1)
    rows = int(max(row_align, min(rows, n)))
    if rows >= n:
        # The whole batch fits: still split into (at least) 2 grid steps so the
        # 'parallel' axis shards across v7x's two TensorCores and the pipeline
        # keeps DMA/compute overlap.  Tiny batches stay a single step.
        if n >= 2 * row_align:
            half = ((n + 1) // 2 + row_align - 1) // row_align * row_align
            return int(min(half, n))
        return int(n)
    rows = max(row_align, (rows // row_align) * row_align)
    return int(min(rows, n))


def poly1_cross_entropy_loss(logits, labels, *, num_classes, epsilon=1.0,
                             reduction="none", weight=None, block_n=None):
    """Pallas-backed Poly1 cross-entropy loss.

    logits: float [N, num_classes], labels: int [N].
    Returns float32 [N] ('none') or scalar ('sum'/'mean').
    """
    n, c = logits.shape
    assert c == num_classes
    labels2d = labels.astype(jnp.int32).reshape(n, 1)
    has_weight = weight is not None

    itemsize = jnp.dtype(logits.dtype).itemsize
    row_align = _row_align(itemsize)
    if block_n is None:
        block_n = _pick_block_n(n, c, itemsize, has_weight)
    assert block_n == n or block_n % row_align == 0, (
        f"block_n must equal N or be a multiple of {row_align} for "
        f"{jnp.dtype(logits.dtype).name} logits")
    grid = pl.cdiv(n, block_n)

    in_specs = [
        pl.BlockSpec((block_n, c), lambda i: (i, 0)),   # logits tile
        pl.BlockSpec((block_n, 1), lambda i: (i, 0)),   # labels tile
    ]
    inputs = [logits, labels2d]
    if has_weight:
        # Gather per-row class weights in the wrapper (O(N)) instead of doing a
        # (TN, C) select + lane reduction per tile inside the kernel.
        w_rows = jnp.asarray(weight, dtype=jnp.float32)[labels].reshape(n, 1)
        in_specs.append(pl.BlockSpec((block_n, 1), lambda i: (i, 0)))
        inputs.append(w_rows)

    kernel = functools.partial(_poly1_kernel, epsilon=float(epsilon),
                               has_weight=has_weight)

    _, vmem_limit = _vmem_budget_and_limit()
    out = pl.pallas_call(
        kernel,
        out_shape=jax.ShapeDtypeStruct((n, 1), jnp.float32),
        grid_spec=pltpu.PrefetchScalarGridSpec(
            num_scalar_prefetch=0,
            grid=(grid,),
            in_specs=in_specs,
            out_specs=pl.BlockSpec((block_n, 1), lambda i: (i, 0)),
        ),
        compiler_params=pltpu.CompilerParams(
            dimension_semantics=("parallel",),
            vmem_limit_bytes=int(vmem_limit),
        ),
    )(*inputs)

    loss = out.reshape(n)
    if reduction == "mean":
        return jnp.mean(loss)   # module does poly1.mean(): plain mean over N
    if reduction == "sum":
        return jnp.sum(loss)
    return loss


def _reference(logits, labels, num_classes, epsilon=1.0, weight=None):
    logits = logits.astype(jnp.float32)
    onehot = jax.nn.one_hot(labels, num_classes, dtype=jnp.float32)
    sm = jax.nn.softmax(logits, axis=-1)
    pt = jnp.sum(onehot * sm, axis=-1)
    log_sm = jax.nn.log_softmax(logits, axis=-1)
    ce = -jnp.sum(onehot * log_sm, axis=-1)
    if weight is not None:
        ce = ce * weight[labels]
    return ce + epsilon * (1.0 - pt)


if __name__ == "__main__":
    key = jax.random.PRNGKey(0)
    k1, k2, k3, k4, k5, k6 = jax.random.split(key, 6)

    # Case 1: small, unweighted, reduction='none'.
    N, C = 8, 32
    logits = jax.random.normal(k1, (N, C), dtype=jnp.float32)
    labels = jax.random.randint(k2, (N,), 0, C, dtype=jnp.int32)
    loss = poly1_cross_entropy_loss(logits, labels, num_classes=C,
                                    epsilon=1.0, reduction="none")
    loss = jax.block_until_ready(loss)
    ref = _reference(logits, labels, C, epsilon=1.0)
    assert loss.shape == (N,)
    assert jnp.allclose(loss, ref, atol=1e-5, rtol=1e-5), (loss, ref)

    # Case 2: multi-step grid, per-class weights (gathered in wrapper),
    # reduction='mean', user-supplied block_n.
    N2, C2 = 64, 160
    logits2 = jax.random.normal(k3, (N2, C2), dtype=jnp.float32)
    labels2 = jax.random.randint(k4, (N2,), 0, C2, dtype=jnp.int32)
    weight2 = jnp.linspace(0.5, 1.5, C2, dtype=jnp.float32)
    loss2 = poly1_cross_entropy_loss(logits2, labels2, num_classes=C2,
                                     epsilon=2.0, reduction="mean",
                                     weight=weight2, block_n=16)
    loss2 = jax.block_until_ready(loss2)
    ref2 = jnp.mean(_reference(logits2, labels2, C2, epsilon=2.0,
                               weight=weight2))
    assert jnp.allclose(loss2, ref2, atol=1e-5, rtol=1e-5), (loss2, ref2)

    # Case 3: auto block_n path — whole batch fits the VMEM budget, so the
    # wrapper splits into >=2 grid steps (megacore / pipelining); 'sum'.
    N3, C3 = 256, 128
    logits3 = jax.random.normal(k5, (N3, C3), dtype=jnp.float32)
    labels3 = jax.random.randint(k6, (N3,), 0, C3, dtype=jnp.int32)
    loss3 = poly1_cross_entropy_loss(logits3, labels3, num_classes=C3,
                                     epsilon=0.5, reduction="sum")
    loss3 = jax.block_until_ready(loss3)
    ref3 = jnp.sum(_reference(logits3, labels3, C3, epsilon=0.5))
    assert jnp.allclose(loss3, ref3, atol=1e-3, rtol=1e-5), (loss3, ref3)

    print("KERNEL_OK")
</pallas_src>

<mosaic_0001>
module attributes {stable_mosaic.version = 11 : i64} {
  func.func @_poly1_kernel(%arg0: i32, %arg1: memref<8x32xf32, #tpu.memory_space<vmem>>, %arg2: memref<8x1xi32, #tpu.memory_space<vmem>>, %arg3: memref<8x1xf32, #tpu.memory_space<vmem>>) attributes {dimension_semantics = [#tpu.dimension_semantics<parallel>], iteration_bounds = array<i64: 1>, scalar_prefetch = 0 : i64, scratch_operands = 0 : i64, tpu.core_type = #tpu.core_type<tc>, window_params = [{transform_indices = @transform_0, window_bounds = array<i64: 8, 32>}, {transform_indices = @transform_1, window_bounds = array<i64: 8, 1>}, {transform_indices = @transform_2, window_bounds = array<i64: 8, 1>}]} {
    %c0 = arith.constant 0 : index
    %c0_0 = arith.constant 0 : index
    %0 = vector.load %arg1[%c0, %c0_0] : memref<8x32xf32, #tpu.memory_space<vmem>>, vector<8x32xf32>
    %c0_1 = arith.constant 0 : index
    %c0_2 = arith.constant 0 : index
    %1 = vector.load %arg2[%c0_1, %c0_2] : memref<8x1xi32, #tpu.memory_space<vmem>>, vector<8x1xi32>
    %2 = tpu.iota {dimensions = array<i32: 1>} : vector<8x32xi32>
    %3 = vector.broadcast %1 : vector<8x1xi32> to vector<8x32xi32>
    %4 = arith.cmpi eq, %2, %3 : vector<8x32xi32>
    %cst = arith.constant dense<0xFF800000> : vector<8xf32>
    %5 = vector.multi_reduction <maximumf>, %0, %cst [1] : vector<8x32xf32> to vector<8xf32>
    %6 = vector.shape_cast %5 : vector<8xf32> to vector<8x1xf32>
    %7 = vector.broadcast %6 : vector<8x1xf32> to vector<8x32xf32>
    %8 = arith.subf %0, %7 : vector<8x32xf32>
    %9 = math.exp %8 : vector<8x32xf32>
    %cst_3 = arith.constant dense<0.000000e+00> : vector<8xf32>
    %10 = vector.multi_reduction <add>, %9, %cst_3 [1] : vector<8x32xf32> to vector<8xf32>
    %11 = vector.shape_cast %10 : vector<8xf32> to vector<8x1xf32>
    %12 = math.log %11 : vector<8x1xf32>
    %cst_4 = arith.constant 0.000000e+00 : f32
    %13 = vector.broadcast %cst_4 : f32 to vector<8x32xf32>
    %14 = arith.select %4, %8, %13 : vector<8x32xi1>, vector<8x32xf32>
    %cst_5 = arith.constant dense<0.000000e+00> : vector<8xf32>
    %15 = vector.multi_reduction <add>, %14, %cst_5 [1] : vector<8x32xf32> to vector<8xf32>
    %16 = vector.shape_cast %15 : vector<8xf32> to vector<8x1xf32>
    %17 = arith.subf %16, %12 : vector<8x1xf32>
    %18 = math.exp %17 : vector<8x1xf32>
    %cst_6 = arith.constant 0.000000e+00 : f32
    %19 = vector.broadcast %cst_6 : f32 to vector<8x1xf32>
    %20 = arith.subf %19, %17 : vector<8x1xf32>
    %cst_7 = arith.constant 1.000000e+00 : f32
    %21 = vector.broadcast %cst_7 : f32 to vector<8x1xf32>
    %22 = arith.subf %21, %18 : vector<8x1xf32>
    %cst_8 = arith.constant 1.000000e+00 : f32
    %23 = vector.broadcast %cst_8 : f32 to vector<8x1xf32>
    %24 = arith.mulf %23, %22 : vector<8x1xf32>
    %25 = arith.addf %20, %24 : vector<8x1xf32>
    %c0_9 = arith.constant 0 : index
    %c0_10 = arith.constant 0 : index
    %26 = vector.load %arg3[%c0_9, %c0_10] : memref<8x1xf32, #tpu.memory_space<vmem>>, vector<8x1xf32>
    tpu.vector_store %arg3[%c0_9, %c0_10], %25 {strides = array<i32>} : memref<8x1xf32, #tpu.memory_space<vmem>>, vector<8x1xf32>,
    return
  }
  func.func @transform_0(%arg0: i32) -> (i32, i32) {
    %c0_i32 = arith.constant 0 : i32
    %c0_i32_0 = arith.constant 0 : i32
    return %arg0, %c0_i32 : i32, i32
  }
  func.func @transform_1(%arg0: i32) -> (i32, i32) {
    %c0_i32 = arith.constant 0 : i32
    %c0_i32_0 = arith.constant 0 : i32
    return %arg0, %c0_i32 : i32, i32
  }
  func.func @transform_2(%arg0: i32) -> (i32, i32) {
    %c0_i32 = arith.constant 0 : i32
    %c0_i32_0 = arith.constant 0 : i32
    return %arg0, %c0_i32 : i32, i32
  }
}

</mosaic_0001>

<bundles_post_ra>
// kernel: tpu_custom_call.1
= control target key start
LH: loop header
LB: loop body
LE: loop exit
PB: predicated region body
PF: predicated region fallthrough
CT: control target
= control target key end

     0   :  { %vm19_vm0 = vcmask 261120   ;;  %v55_v1 = vmov 0   ;;  %v13_v7 = vlaneseq  ;;  %vm41_vm2 = vcmask 7168   ;;  %s83_s0 = inlined_call_operand.vmem [shape: f32[8,32], index: 0, kind: input, shape index: {}]   ;;  %s84_s1 = inlined_call_operand.vmem [shape: s32[8,1], index: 1, kind: input, shape index: {}]   ;;  %s85_s2 = inlined_call_operand.vmem [shape: f32[8,1], index: 2, kind: output, shape index: {}]  }
   0x1   :  { %v11_v0 = vld [vmem:[%s83_s0] sm:$0xff]  ;;  %48 = vset.pattern.permute.xlu0 %v55_v1 }
   0x2   :  { %v20_v2 = vsel %vm19_vm0, %v11_v0, -inf  ;;  %v12_v3 = vld [vmem:[%s84_s1] sm:$0xff]  ;;  %v14_v8 = vand.u32 127, %v13_v7 }
   0x3   :  { %21 = vmax.xlane.f32.xlu0 %v20_v2 }
  0x19   :  { %16 = vperm.xlu0 %48, %v12_v3  }
  0x8c   :  { %v22_v4 = vpop.xlane.xlu0 %21 }
  0x8d   :  { %v23_v5 = vsub.f32 %v11_v0, %v22_v4 }
  0x8f   :  { %v24_v6 = vmul.f32 1.442695, %v23_v5 }
  0x91   :  { %49 = vpow2.f32 %v24_v6 }
  0x94   :  { %v17_v9 = vpop.permute.xlu0 %16 }
  0x95   :  { %vm18_vm1 = vcmp.eq.s32.totalorder %v14_v8, %v17_v9 }
  0x96   :  { %v31_v12 = vsel %vm18_vm1, %v23_v5, 0.0 }
  0x97   :  { %v32_v13 = vsel %vm19_vm0, %v31_v12, 0.0 }
  0x9e   :  { %v50_v10 = vpop.eup %49 }
  0x9f   :  { %v26_v11 = vsel %vm19_vm0, %v50_v10, 0.0 }
  0xa0   :  { %27 = vadd.xlane.f32.xlu1 %v26_v11 }
  0xa4   :  { %33 = vadd.xlane.f32.xlu1 %v32_v13 }
 0x129   :  { %v28_v14 = vpop.xlane.xlu1 %27 }
 0x12a   :  { %51 = vlog2.f32 %v28_v14 }
 0x12d   :  { %v34_v17 = vpop.xlane.xlu1 %33 }
 0x137   :  { %v52_v15 = vpop.eup %51 }
 0x138   :  { %v30_v16 = vmul.f32 0.6931472, %v52_v15 }
 0x13a   :  { %v35_v18 = vsub.f32 %v34_v17, %v30_v16 }
 0x13c   :  { %v36_v19 = vmul.f32 1.442695, %v35_v18  ;;  %v38_v21 = vsub.f32 0.0, %v35_v18 }
 0x13e   :  { %53 = vpow2.f32 %v36_v19 }
 0x14b   :  { %v54_v20 = vpop.eup %53 }
 0x14c   :  { %v39_v22 = vsub.f32 1.0, %v54_v20 }
 0x14e   :  { %v40_v23 = vadd.f32 %v39_v22, %v38_v21 }
 0x150   :  { %42 = vst.msk [vmem:[%s85_s2] sm:$0xff] %vm41_vm2, %v40_v23 }

</bundles_post_ra>
